<compile_context>
chip_gen: v7x
topology: tpu7x:2x2x1
jax: 0.10.0
libtpu: 0.0.40
codegen_flags: <defaults>
</compile_context>

<pallas_src>
import functools

import numpy as np
import jax
import jax.numpy as jnp
from jax import lax
from jax.experimental import pallas as pl
from jax.experimental.pallas import tpu as pltpu

KH = KW = 3  # 3x3 conv, padding=1 -> "same"


def _conv_block_kernel(x_ref, w_ref, m_ref, o_ref, patch_ref, *, W):
    """One block of `nblk` flattened (B*T) samples, full 3x3 'same' conv.

    x_ref:     (nblk, Cin, H*W)   NCHW input block, spatial flattened
    w_ref:     (Cout, K1)         tap-stacked weights + bias column (resident)
    m_ref:     (KH*KW, H*W)       per-tap validity masks, f32 (resident)
    o_ref:     (nblk, Cout, H*W)  channel-major, lane-dense output block
    patch_ref: (nblk, K1, H*W)    VMEM scratch: shifted taps + ones row (bf16)
    """
    nblk, cin, hw = x_ref.shape
    k1 = patch_ref.shape[1]               # KH*KW*cin + 1 (ones/bias row last)

    x = x_ref[...]
    # Build the 9 shifted+masked tap planes with lane rotations (XLU slot) and
    # full-lane, unmasked stores.  The precomputed masks zero every destination
    # whose 2-D source is out of the image, including the row-wrap lanes the
    # flattened-spatial rotation introduces, so no scratch zero-fill and no
    # partial lane stores are needed.  (This invariant is specific to 3x3,
    # pad=1; re-derive masks/deltas if kernel size or padding ever change.)
    for t in range(KH * KW):
        dh, dw = t // KW - 1, t % KW - 1
        delta = dh * W + dw
        shifted = x if delta == 0 else pltpu.roll(x, (-delta) % hw, axis=2)
        if dh == 0 and dw == 0:
            tap = shifted                        # center tap: mask is all ones
        else:
            # Mask multiply in f32 (v5e VPU has no bf16); cast on store.
            tap = shifted * m_ref[t:t + 1, :]
        patch_ref[:, t * cin:(t + 1) * cin, :] = tap.astype(patch_ref.dtype)
    # Constant ones row: the bias is folded into the weights as column K1-1.
    patch_ref[:, k1 - 1:k1, :] = jnp.ones((nblk, 1, hw), patch_ref.dtype)

    # Stationary (Cout, K1) weights; one plain 2-D MXU matmul per sample
    # (no nblk-batched dot, no nblk-fold broadcast of the weight tile).
    w = w_ref[...]
    for b in range(nblk):
        acc = jnp.dot(w, patch_ref[b], preferred_element_type=jnp.float32)
        o_ref[b] = acc.astype(o_ref.dtype)       # (Cout, H*W) lane-dense store


def _vmem_capacity_bytes():
    """Physical VMEM of the attached TPU (fallback: v7x's 64 MiB per core)."""
    try:
        return int(pltpu.get_tpu_info().vmem_capacity_bytes)
    except Exception:
        return 64 << 20


def _pick_block(n, cin, cout, hw, io_itemsize, compute_itemsize, vmem_cap):
    """Samples per grid step.

    Live-VMEM accounting: input and output blocks are each double-buffered by
    the BlockSpec pipeline; the patch scratch is single-buffered.  Budget is
    generation-aware (~1/3 of physical VMEM, capped at 40 MiB → ~21 MiB on
    v7x's 64 MiB, 40 MiB on v5e/v6e's 128 MiB), and we keep >= 4 grid steps so
    both v7x TensorCores get >= 2 pipelined steps each.
    """
    k1 = KH * KW * cin + 1
    per_sample = (2 * cin * hw * io_itemsize        # x block (double-buffered)
                  + 2 * cout * hw * io_itemsize     # out block (double-buffered)
                  + k1 * hw * compute_itemsize)     # patch scratch (single)
    budget = min(vmem_cap // 3, 40 << 20)
    cap = max(1, budget // per_sample)
    min_steps = 4 if n >= 4 else 1
    nblk = max(1, min(n, cap, n // min_steps, 128))
    while n % nblk:
        nblk -= 1
    return nblk


def time_distributed_conv2d(x_bt_chw, w_oihw, bias, *, nblk=None,
                            compute_dtype=jnp.bfloat16):
    """TimeDistributed(Conv2d(3x3, padding=1)) forward.

    x_bt_chw: (B, T, Cin, H, W)   PyTorch NCHW with a time axis
    w_oihw:   (Cout, Cin, KH, KW)
    bias:     (Cout,)
    returns:  (B, T, Cout, H, W)
    """
    B, T, Cin, H, W = x_bt_chw.shape
    Cout = w_oihw.shape[0]
    N, HW = B * T, H * W
    K1 = KH * KW * Cin + 1

    # ---- free (contiguous) reshapes only: no pad / transpose HBM passes ----
    x_flat = x_bt_chw.reshape(N, Cin, HW)

    # Tap-stacked weights with bias folded in as the last contraction row:
    # w_aug[o, t*Cin + c] = w[o, c, kh, kw] (t = kh*KW + kw), w_aug[o, -1] = b[o].
    w_taps = jnp.transpose(w_oihw, (0, 2, 3, 1)).reshape(Cout, KH * KW * Cin)
    w_aug = jnp.concatenate([w_taps, bias.reshape(Cout, 1)],
                            axis=1).astype(compute_dtype)

    # Per-tap validity masks over the flattened spatial axis (tiny constant).
    rr = np.arange(HW) // W
    cc = np.arange(HW) % W
    masks = np.zeros((KH * KW, HW), np.float32)
    for t in range(KH * KW):
        dh, dw = t // KW - 1, t % KW - 1
        masks[t] = ((rr + dh >= 0) & (rr + dh < H)
                    & (cc + dw >= 0) & (cc + dw < W))
    masks = jnp.asarray(masks)

    vmem_cap = _vmem_capacity_bytes()
    if nblk is None:
        nblk = _pick_block(N, Cin, Cout, HW,
                           np.dtype(x_bt_chw.dtype).itemsize,
                           np.dtype(compute_dtype).itemsize,
                           vmem_cap)
    grid = (N // nblk,)
    # Scoped-VMEM limit, generation-aware: <= ~48 MiB on v7x (64 MiB physical),
    # 64 MiB on v5e/v6e (128 MiB physical) so it never binds before the budget.
    vmem_limit = max(32 << 20, min(vmem_cap * 3 // 4, 64 << 20))

    kernel = functools.partial(_conv_block_kernel, W=W)
    out = pl.pallas_call(
        kernel,
        out_shape=jax.ShapeDtypeStruct((N, Cout, HW), x_bt_chw.dtype),
        grid_spec=pltpu.PrefetchScalarGridSpec(
            num_scalar_prefetch=0,
            grid=grid,
            in_specs=[
                pl.BlockSpec((nblk, Cin, HW), lambda i: (i, 0, 0)),
                pl.BlockSpec((Cout, K1), lambda i: (0, 0)),
                pl.BlockSpec((KH * KW, HW), lambda i: (0, 0)),
            ],
            out_specs=pl.BlockSpec((nblk, Cout, HW), lambda i: (i, 0, 0)),
            scratch_shapes=[pltpu.VMEM((nblk, K1, HW), compute_dtype)],
        ),
        compiler_params=pltpu.CompilerParams(
            dimension_semantics=("parallel",),
            vmem_limit_bytes=vmem_limit),
    )(x_flat, w_aug, masks)

    # Channel-major output -> free reshape back to (B, T, Cout, H, W).
    return out.reshape(B, T, Cout, H, W)


if __name__ == "__main__":
    # Small deterministic example: batch=2, seq(time)=8, channels=4, spatial=16.
    B, T, Cin, H, W = 2, 8, 4, 16, 16
    Cout = 8

    key = jax.random.PRNGKey(0)
    kx, kw_key, kb = jax.random.split(key, 3)
    x = jax.random.normal(kx, (B, T, Cin, H, W), dtype=jnp.float32)
    w = (jax.random.normal(kw_key, (Cout, Cin, KH, KW), dtype=jnp.float32)
         * (1.0 / (Cin * KH * KW) ** 0.5))
    b = jax.random.normal(kb, (Cout,), dtype=jnp.float32) * 0.01

    y = jax.block_until_ready(time_distributed_conv2d(x, w, b))

    # Correctness check: the kernel feeds bf16 operands to the MXU with f32
    # accumulation, so compare against an f32 reference conv on the same
    # bf16-rounded operands (identical products, only sum order differs).
    xq = x.astype(jnp.bfloat16).astype(jnp.float32)
    wq = w.astype(jnp.bfloat16).astype(jnp.float32)
    bq = b.astype(jnp.bfloat16).astype(jnp.float32)
    ref = lax.conv_general_dilated(
        xq.reshape(B * T, Cin, H, W), wq,
        window_strides=(1, 1), padding=((1, 1), (1, 1)),
        dimension_numbers=("NCHW", "OIHW", "NCHW"),
        precision=lax.Precision.HIGHEST,
        preferred_element_type=jnp.float32)
    ref = (ref + bq.reshape(1, Cout, 1, 1)).reshape(B, T, Cout, H, W)

    assert y.shape == (B, T, Cout, H, W)
    err = float(jnp.max(jnp.abs(y - ref)))
    assert jnp.allclose(y, ref, atol=1e-3, rtol=1e-3), f"max abs err {err}"

    print("KERNEL_OK")
</pallas_src>

<mosaic_0001>
module attributes {stable_mosaic.version = 11 : i64} {
  func.func @_conv_block_kernel(%arg0: i32, %arg1: memref<4x4x256xf32, #tpu.memory_space<vmem>>, %arg2: memref<8x37xbf16, #tpu.memory_space<vmem>>, %arg3: memref<9x256xf32, #tpu.memory_space<vmem>>, %arg4: memref<4x8x256xf32, #tpu.memory_space<vmem>>, %arg5: memref<4x37x256xbf16, #tpu.memory_space<vmem>>) attributes {dimension_semantics = [#tpu.dimension_semantics<parallel>], iteration_bounds = array<i64: 4>, scalar_prefetch = 0 : i64, scratch_operands = 1 : i64, tpu.core_type = #tpu.core_type<tc>, window_params = [{transform_indices = @transform_0, window_bounds = array<i64: 4, 4, 256>}, {pipeline_mode = #tpu.pipeline_mode<synchronous>, transform_indices = @transform_1, window_bounds = array<i64: 8, 37>}, {pipeline_mode = #tpu.pipeline_mode<synchronous>, transform_indices = @transform_2, window_bounds = array<i64: 9, 256>}, {transform_indices = @transform_3, window_bounds = array<i64: 4, 8, 256>}]} {
    %c0 = arith.constant 0 : index
    %c0_0 = arith.constant 0 : index
    %c0_1 = arith.constant 0 : index
    %0 = vector.load %arg1[%c0, %c0_0, %c0_1] : memref<4x4x256xf32, #tpu.memory_space<vmem>>, vector<4x4x256xf32>
    %c17_i32 = arith.constant 17 : i32
    %1 = tpu.dynamic_rotate %0 by %c17_i32 dim 2 : vector<4x4x256xf32>, i32 -> vector<4x4x256xf32>
    %c0_2 = arith.constant 0 : index
    %c0_3 = arith.constant 0 : index
    %2 = vector.load %arg3[%c0_2, %c0_3] : memref<9x256xf32, #tpu.memory_space<vmem>>, vector<1x256xf32>
    %3 = vector.shape_cast %2 : vector<1x256xf32> to vector<1x1x256xf32>
    %4 = vector.broadcast %3 : vector<1x1x256xf32> to vector<4x4x256xf32>
    %5 = arith.mulf %1, %4 : vector<4x4x256xf32>
    %6 = arith.truncf %5 : vector<4x4x256xf32> to vector<4x4x256xbf16>
    %c0_4 = arith.constant 0 : index
    %c0_5 = arith.constant 0 : index
    %c0_6 = arith.constant 0 : index
    %7 = vector.load %arg5[%c0_4, %c0_5, %c0_6] : memref<4x37x256xbf16, #tpu.memory_space<vmem>>, vector<4x4x256xbf16>
    tpu.vector_store %arg5[%c0_4, %c0_5, %c0_6], %6 {strides = array<i32>} : memref<4x37x256xbf16, #tpu.memory_space<vmem>>, vector<4x4x256xbf16>,
    %c16_i32 = arith.constant 16 : i32
    %8 = tpu.dynamic_rotate %0 by %c16_i32 dim 2 : vector<4x4x256xf32>, i32 -> vector<4x4x256xf32>
    %c1 = arith.constant 1 : index
    %c0_7 = arith.constant 0 : index
    %9 = vector.load %arg3[%c1, %c0_7] : memref<9x256xf32, #tpu.memory_space<vmem>>, vector<1x256xf32>
    %10 = vector.shape_cast %9 : vector<1x256xf32> to vector<1x1x256xf32>
    %11 = vector.broadcast %10 : vector<1x1x256xf32> to vector<4x4x256xf32>
    %12 = arith.mulf %8, %11 : vector<4x4x256xf32>
    %13 = arith.truncf %12 : vector<4x4x256xf32> to vector<4x4x256xbf16>
    %c0_8 = arith.constant 0 : index
    %c4 = arith.constant 4 : index
    %c0_9 = arith.constant 0 : index
    %14 = vector.load %arg5[%c0_8, %c4, %c0_9] : memref<4x37x256xbf16, #tpu.memory_space<vmem>>, vector<4x4x256xbf16>
    tpu.vector_store %arg5[%c0_8, %c4, %c0_9], %13 {strides = array<i32>} : memref<4x37x256xbf16, #tpu.memory_space<vmem>>, vector<4x4x256xbf16>,
    %c15_i32 = arith.constant 15 : i32
    %15 = tpu.dynamic_rotate %0 by %c15_i32 dim 2 : vector<4x4x256xf32>, i32 -> vector<4x4x256xf32>
    %c2 = arith.constant 2 : index
    %c0_10 = arith.constant 0 : index
    %16 = vector.load %arg3[%c2, %c0_10] : memref<9x256xf32, #tpu.memory_space<vmem>>, vector<1x256xf32>
    %17 = vector.shape_cast %16 : vector<1x256xf32> to vector<1x1x256xf32>
    %18 = vector.broadcast %17 : vector<1x1x256xf32> to vector<4x4x256xf32>
    %19 = arith.mulf %15, %18 : vector<4x4x256xf32>
    %20 = arith.truncf %19 : vector<4x4x256xf32> to vector<4x4x256xbf16>
    %c0_11 = arith.constant 0 : index
    %c8 = arith.constant 8 : index
    %c0_12 = arith.constant 0 : index
    %21 = vector.load %arg5[%c0_11, %c8, %c0_12] : memref<4x37x256xbf16, #tpu.memory_space<vmem>>, vector<4x4x256xbf16>
    tpu.vector_store %arg5[%c0_11, %c8, %c0_12], %20 {strides = array<i32>} : memref<4x37x256xbf16, #tpu.memory_space<vmem>>, vector<4x4x256xbf16>,
    %c1_i32 = arith.constant 1 : i32
    %22 = tpu.dynamic_rotate %0 by %c1_i32 dim 2 : vector<4x4x256xf32>, i32 -> vector<4x4x256xf32>
    %c3 = arith.constant 3 : index
    %c0_13 = arith.constant 0 : index
    %23 = vector.load %arg3[%c3, %c0_13] : memref<9x256xf32, #tpu.memory_space<vmem>>, vector<1x256xf32>
    %24 = vector.shape_cast %23 : vector<1x256xf32> to vector<1x1x256xf32>
    %25 = vector.broadcast %24 : vector<1x1x256xf32> to vector<4x4x256xf32>
    %26 = arith.mulf %22, %25 : vector<4x4x256xf32>
    %27 = arith.truncf %26 : vector<4x4x256xf32> to vector<4x4x256xbf16>
    %c0_14 = arith.constant 0 : index
    %c12 = arith.constant 12 : index
    %c0_15 = arith.constant 0 : index
    %28 = vector.load %arg5[%c0_14, %c12, %c0_15] : memref<4x37x256xbf16, #tpu.memory_space<vmem>>, vector<4x4x256xbf16>
    tpu.vector_store %arg5[%c0_14, %c12, %c0_15], %27 {strides = array<i32>} : memref<4x37x256xbf16, #tpu.memory_space<vmem>>, vector<4x4x256xbf16>,
    %29 = arith.truncf %0 : vector<4x4x256xf32> to vector<4x4x256xbf16>
    %c0_16 = arith.constant 0 : index
    %c16 = arith.constant 16 : index
    %c0_17 = arith.constant 0 : index
    %30 = vector.load %arg5[%c0_16, %c16, %c0_17] : memref<4x37x256xbf16, #tpu.memory_space<vmem>>, vector<4x4x256xbf16>
    tpu.vector_store %arg5[%c0_16, %c16, %c0_17], %29 {strides = array<i32>} : memref<4x37x256xbf16, #tpu.memory_space<vmem>>, vector<4x4x256xbf16>,
    %c255_i32 = arith.constant 255 : i32
    %31 = tpu.dynamic_rotate %0 by %c255_i32 dim 2 : vector<4x4x256xf32>, i32 -> vector<4x4x256xf32>
    %c5 = arith.constant 5 : index
    %c0_18 = arith.constant 0 : index
    %32 = vector.load %arg3[%c5, %c0_18] : memref<9x256xf32, #tpu.memory_space<vmem>>, vector<1x256xf32>
    %33 = vector.shape_cast %32 : vector<1x256xf32> to vector<1x1x256xf32>
    %34 = vector.broadcast %33 : vector<1x1x256xf32> to vector<4x4x256xf32>
    %35 = arith.mulf %31, %34 : vector<4x4x256xf32>
    %36 = arith.truncf %35 : vector<4x4x256xf32> to vector<4x4x256xbf16>
    %c0_19 = arith.constant 0 : index
    %c20 = arith.constant 20 : index
    %c0_20 = arith.constant 0 : index
    %37 = vector.load %arg5[%c0_19, %c20, %c0_20] : memref<4x37x256xbf16, #tpu.memory_space<vmem>>, vector<4x4x256xbf16>
    tpu.vector_store %arg5[%c0_19, %c20, %c0_20], %36 {strides = array<i32>} : memref<4x37x256xbf16, #tpu.memory_space<vmem>>, vector<4x4x256xbf16>,
    %c241_i32 = arith.constant 241 : i32
    %38 = tpu.dynamic_rotate %0 by %c241_i32 dim 2 : vector<4x4x256xf32>, i32 -> vector<4x4x256xf32>
    %c6 = arith.constant 6 : index
    %c0_21 = arith.constant 0 : index
    %39 = vector.load %arg3[%c6, %c0_21] : memref<9x256xf32, #tpu.memory_space<vmem>>, vector<1x256xf32>
    %40 = vector.shape_cast %39 : vector<1x256xf32> to vector<1x1x256xf32>
    %41 = vector.broadcast %40 : vector<1x1x256xf32> to vector<4x4x256xf32>
    %42 = arith.mulf %38, %41 : vector<4x4x256xf32>
    %43 = arith.truncf %42 : vector<4x4x256xf32> to vector<4x4x256xbf16>
    %c0_22 = arith.constant 0 : index
    %c24 = arith.constant 24 : index
    %c0_23 = arith.constant 0 : index
    %44 = vector.load %arg5[%c0_22, %c24, %c0_23] : memref<4x37x256xbf16, #tpu.memory_space<vmem>>, vector<4x4x256xbf16>
    tpu.vector_store %arg5[%c0_22, %c24, %c0_23], %43 {strides = array<i32>} : memref<4x37x256xbf16, #tpu.memory_space<vmem>>, vector<4x4x256xbf16>,
    %c240_i32 = arith.constant 240 : i32
    %45 = tpu.dynamic_rotate %0 by %c240_i32 dim 2 : vector<4x4x256xf32>, i32 -> vector<4x4x256xf32>
    %c7 = arith.constant 7 : index
    %c0_24 = arith.constant 0 : index
    %46 = vector.load %arg3[%c7, %c0_24] : memref<9x256xf32, #tpu.memory_space<vmem>>, vector<1x256xf32>
    %47 = vector.shape_cast %46 : vector<1x256xf32> to vector<1x1x256xf32>
    %48 = vector.broadcast %47 : vector<1x1x256xf32> to vector<4x4x256xf32>
    %49 = arith.mulf %45, %48 : vector<4x4x256xf32>
    %50 = arith.truncf %49 : vector<4x4x256xf32> to vector<4x4x256xbf16>
    %c0_25 = arith.constant 0 : index
    %c28 = arith.constant 28 : index
    %c0_26 = arith.constant 0 : index
    %51 = vector.load %arg5[%c0_25, %c28, %c0_26] : memref<4x37x256xbf16, #tpu.memory_space<vmem>>, vector<4x4x256xbf16>
    tpu.vector_store %arg5[%c0_25, %c28, %c0_26], %50 {strides = array<i32>} : memref<4x37x256xbf16, #tpu.memory_space<vmem>>, vector<4x4x256xbf16>,
    %c239_i32 = arith.constant 239 : i32
    %52 = tpu.dynamic_rotate %0 by %c239_i32 dim 2 : vector<4x4x256xf32>, i32 -> vector<4x4x256xf32>
    %c8_27 = arith.constant 8 : index
    %c0_28 = arith.constant 0 : index
    %53 = vector.load %arg3[%c8_27, %c0_28] : memref<9x256xf32, #tpu.memory_space<vmem>>, vector<1x256xf32>
    %54 = vector.shape_cast %53 : vector<1x256xf32> to vector<1x1x256xf32>
    %55 = vector.broadcast %54 : vector<1x1x256xf32> to vector<4x4x256xf32>
    %56 = arith.mulf %52, %55 : vector<4x4x256xf32>
    %57 = arith.truncf %56 : vector<4x4x256xf32> to vector<4x4x256xbf16>
    %c0_29 = arith.constant 0 : index
    %c32 = arith.constant 32 : index
    %c0_30 = arith.constant 0 : index
    %58 = vector.load %arg5[%c0_29, %c32, %c0_30] : memref<4x37x256xbf16, #tpu.memory_space<vmem>>, vector<4x4x256xbf16>
    tpu.vector_store %arg5[%c0_29, %c32, %c0_30], %57 {strides = array<i32>} : memref<4x37x256xbf16, #tpu.memory_space<vmem>>, vector<4x4x256xbf16>,
    %cst = arith.constant 1.000000e+00 : bf16
    %59 = vector.broadcast %cst : bf16 to vector<4x1x256xbf16>
    %c0_31 = arith.constant 0 : index
    %c36 = arith.constant 36 : index
    %c0_32 = arith.constant 0 : index
    %60 = vector.load %arg5[%c0_31, %c36, %c0_32] : memref<4x37x256xbf16, #tpu.memory_space<vmem>>, vector<4x1x256xbf16>
    tpu.vector_store %arg5[%c0_31, %c36, %c0_32], %59 {strides = array<i32>} : memref<4x37x256xbf16, #tpu.memory_space<vmem>>, vector<4x1x256xbf16>,
    %c0_33 = arith.constant 0 : index
    %c0_34 = arith.constant 0 : index
    %61 = vector.load %arg2[%c0_33, %c0_34] : memref<8x37xbf16, #tpu.memory_space<vmem>>, vector<8x37xbf16>
    %c0_35 = arith.constant 0 : index
    %c0_36 = arith.constant 0 : index
    %c0_37 = arith.constant 0 : index
    %62 = vector.load %arg5[%c0_35, %c0_36, %c0_37] : memref<4x37x256xbf16, #tpu.memory_space<vmem>>, vector<1x37x256xbf16>
    %63 = vector.shape_cast %62 : vector<1x37x256xbf16> to vector<37x256xbf16>
    %cst_38 = arith.constant dense<0.000000e+00> : vector<8x256xf32>
    %64 = tpu.matmul %61, %63, %cst_38 {dimension_numbers = #tpu.dot_dimension_numbers<[1], [0], [0], [1], [0, 0, 1, 1], [], []>} : vector<8x37xbf16>, vector<37x256xbf16>, vector<8x256xf32> -> vector<8x256xf32>
    %c0_39 = arith.constant 0 : index
    %c0_40 = arith.constant 0 : index
    %c0_41 = arith.constant 0 : index
    %65 = vector.load %arg4[%c0_39, %c0_40, %c0_41] : memref<4x8x256xf32, #tpu.memory_space<vmem>>, vector<1x8x256xf32>
    %66 = vector.shape_cast %65 : vector<1x8x256xf32> to vector<8x256xf32>
    %67 = vector.shape_cast %64 : vector<8x256xf32> to vector<1x8x256xf32>
    tpu.vector_store %arg4[%c0_39, %c0_40, %c0_41], %67 {strides = array<i32>} : memref<4x8x256xf32, #tpu.memory_space<vmem>>, vector<1x8x256xf32>,
    %c1_42 = arith.constant 1 : index
    %c0_43 = arith.constant 0 : index
    %c0_44 = arith.constant 0 : index
    %68 = vector.load %arg5[%c1_42, %c0_43, %c0_44] : memref<4x37x256xbf16, #tpu.memory_space<vmem>>, vector<1x37x256xbf16>
    %69 = vector.shape_cast %68 : vector<1x37x256xbf16> to vector<37x256xbf16>
    %cst_45 = arith.constant dense<0.000000e+00> : vector<8x256xf32>
    %70 = tpu.matmul %61, %69, %cst_45 {dimension_numbers = #tpu.dot_dimension_numbers<[1], [0], [0], [1], [0, 0, 1, 1], [], []>} : vector<8x37xbf16>, vector<37x256xbf16>, vector<8x256xf32> -> vector<8x256xf32>
    %c1_46 = arith.constant 1 : index
    %c0_47 = arith.constant 0 : index
    %c0_48 = arith.constant 0 : index
    %71 = vector.load %arg4[%c1_46, %c0_47, %c0_48] : memref<4x8x256xf32, #tpu.memory_space<vmem>>, vector<1x8x256xf32>
    %72 = vector.shape_cast %71 : vector<1x8x256xf32> to vector<8x256xf32>
    %73 = vector.shape_cast %70 : vector<8x256xf32> to vector<1x8x256xf32>
    tpu.vector_store %arg4[%c1_46, %c0_47, %c0_48], %73 {strides = array<i32>} : memref<4x8x256xf32, #tpu.memory_space<vmem>>, vector<1x8x256xf32>,
    %c2_49 = arith.constant 2 : index
    %c0_50 = arith.constant 0 : index
    %c0_51 = arith.constant 0 : index
    %74 = vector.load %arg5[%c2_49, %c0_50, %c0_51] : memref<4x37x256xbf16, #tpu.memory_space<vmem>>, vector<1x37x256xbf16>
    %75 = vector.shape_cast %74 : vector<1x37x256xbf16> to vector<37x256xbf16>
    %cst_52 = arith.constant dense<0.000000e+00> : vector<8x256xf32>
    %76 = tpu.matmul %61, %75, %cst_52 {dimension_numbers = #tpu.dot_dimension_numbers<[1], [0], [0], [1], [0, 0, 1, 1], [], []>} : vector<8x37xbf16>, vector<37x256xbf16>, vector<8x256xf32> -> vector<8x256xf32>
    %c2_53 = arith.constant 2 : index
    %c0_54 = arith.constant 0 : index
    %c0_55 = arith.constant 0 : index
    %77 = vector.load %arg4[%c2_53, %c0_54, %c0_55] : memref<4x8x256xf32, #tpu.memory_space<vmem>>, vector<1x8x256xf32>
    %78 = vector.shape_cast %77 : vector<1x8x256xf32> to vector<8x256xf32>
    %79 = vector.shape_cast %76 : vector<8x256xf32> to vector<1x8x256xf32>
    tpu.vector_store %arg4[%c2_53, %c0_54, %c0_55], %79 {strides = array<i32>} : memref<4x8x256xf32, #tpu.memory_space<vmem>>, vector<1x8x256xf32>,
    %c3_56 = arith.constant 3 : index
    %c0_57 = arith.constant 0 : index
    %c0_58 = arith.constant 0 : index
    %80 = vector.load %arg5[%c3_56, %c0_57, %c0_58] : memref<4x37x256xbf16, #tpu.memory_space<vmem>>, vector<1x37x256xbf16>
    %81 = vector.shape_cast %80 : vector<1x37x256xbf16> to vector<37x256xbf16>
    %cst_59 = arith.constant dense<0.000000e+00> : vector<8x256xf32>
    %82 = tpu.matmul %61, %81, %cst_59 {dimension_numbers = #tpu.dot_dimension_numbers<[1], [0], [0], [1], [0, 0, 1, 1], [], []>} : vector<8x37xbf16>, vector<37x256xbf16>, vector<8x256xf32> -> vector<8x256xf32>
    %c3_60 = arith.constant 3 : index
    %c0_61 = arith.constant 0 : index
    %c0_62 = arith.constant 0 : index
    %83 = vector.load %arg4[%c3_60, %c0_61, %c0_62] : memref<4x8x256xf32, #tpu.memory_space<vmem>>, vector<1x8x256xf32>
    %84 = vector.shape_cast %83 : vector<1x8x256xf32> to vector<8x256xf32>
    %85 = vector.shape_cast %82 : vector<8x256xf32> to vector<1x8x256xf32>
    tpu.vector_store %arg4[%c3_60, %c0_61, %c0_62], %85 {strides = array<i32>} : memref<4x8x256xf32, #tpu.memory_space<vmem>>, vector<1x8x256xf32>,
    return
  }
  func.func @transform_0(%arg0: i32) -> (i32, i32, i32) {
    %c0_i32 = arith.constant 0 : i32
    %c0_i32_0 = arith.constant 0 : i32
    %c0_i32_1 = arith.constant 0 : i32
    return %arg0, %c0_i32, %c0_i32_0 : i32, i32, i32
  }
  func.func @transform_1(%arg0: i32) -> (i32, i32) {
    %c0_i32 = arith.constant 0 : i32
    %c0_i32_0 = arith.constant 0 : i32
    %c0_i32_1 = arith.constant 0 : i32
    return %c0_i32, %c0_i32_0 : i32, i32
  }
  func.func @transform_2(%arg0: i32) -> (i32, i32) {
    %c0_i32 = arith.constant 0 : i32
    %c0_i32_0 = arith.constant 0 : i32
    %c0_i32_1 = arith.constant 0 : i32
    return %c0_i32, %c0_i32_0 : i32, i32
  }
  func.func @transform_3(%arg0: i32) -> (i32, i32, i32) {
    %c0_i32 = arith.constant 0 : i32
    %c0_i32_0 = arith.constant 0 : i32
    %c0_i32_1 = arith.constant 0 : i32
    return %arg0, %c0_i32, %c0_i32_0 : i32, i32, i32
  }
}

</mosaic_0001>

<bundles_post_ra>
// kernel: tpu_custom_call.1
= control target key start
LH: loop header
LB: loop body
LE: loop exit
PB: predicated region body
PF: predicated region fallthrough
CT: control target
= control target key end

     0   :  { %8 = vsyncpa [#allocation4], 0  ;;  %s2462_s0 = inlined_call_operand.hbm [shape: f32[16,4,256], index: 0, kind: input, shape index: {}]   ;;  %s2463_s1 = inlined_call_operand.hbm [shape: bf16[8,37], index: 1, kind: input, shape index: {}]   ;;  %s2464_s2 = inlined_call_operand.hbm [shape: f32[9,256], index: 2, kind: input, shape index: {}]   ;;  %s2465_s3 = inlined_call_operand.hbm [shape: f32[16,8,256], index: 3, kind: output, shape index: {}]  }
   0x1   :  { %10 = vsyncpa [#allocation4 + $0x1], 0 }
   0x2   :  { %11 = vsyncpa [#allocation7], 0 }
   0x3   :  { %12 = vsyncpa [#allocation5], 0 }
   0x4   :  { %14 = vsyncpa [#allocation5 + $0x1], 0  ;;  %s1848_s12 = smov 0   ;;  %s1850_s13 = smov 0  }
   0x5   :  { %s1852_s14 = smov 0   ;;  %s1854_s15 = smov 0  }
   0x6 LB: > { %s1869_s16 = sadd.s32 4294967295, %s1807_s15   ;;  %s1403_s17 = sadd.s32 4294967294, %s1807_s15   ;;  %s1807_s15 = sphi %s1854_s15, %s2490_s15   ;;  %s1803_s14 = sphi %s1852_s14, %s2489_s14   ;;  %s1799_s13 = sphi %s1850_s13, %s2488_s13   ;;  %s1795_s12 = sphi %s1848_s12, %s2487_s12  }
   0x7   : > { %s1873_s18 = sadd.s32 1, %s1807_s15   ;;  %s27_s19 = sadd.s32 1, %s1803_s14 }
   0x8   : > { %s24_s20 = ssub.s32 %s1807_s15, %s1873_s18  ;;  %p34_p0 = scmp.ne.s32.totalorder %s1803_s14, %s1799_s13 }
   0x9   : > { %p25_p1 = scmp.eq.s32.totalorder %s24_s20, 0  ;;  %p35_p2 = scmp.eq.s32.totalorder %s1807_s15, 0 }
   0xa   : > { %p40_p3 = scmp.ne.s32.totalorder %s1799_s13, %s1795_s12  ;;  %p2466_p4 = scmp.eq.s32.totalorder %s1869_s16, 0 }
   0xb   : > { %s1885_s21 = scalar_select %p25_p1, %s1803_s14, %s27_s19  }
   0xc   : > { %p1887_p5 = por %p35_p2, %p34_p0  ;;  %p1893_p6 = por %p2466_p4, %p40_p3 }
   0xd   : > { %p106_p7 = scmp.eq.s32.totalorder %s1869_s16, 3  ;;  %p112_p8 = scmp.eq.s32.totalorder %s1403_s17, 3 }
   0xe   : > { %s2472_s23 = scalar_select %p1893_p6, 1, 0 }
   0xf   : > { %p1404_p9 = scmp.ge.s32.totalorder %s1807_s15, 1  ;;  %p119_p10 = scmp.lt.s32.totalorder %s1807_s15, 5 }
  0x10   : > { %p1900_p11 = por %p106_p7, %p34_p0  ;;  %p1904_p12 = por %p112_p8, %p40_p3 }
  0x11   : > { %p1908_p13 = pnand %p1404_p9, %p119_p10  ;;  %s1809_s27 = smov [#allocation6]  }
  0x12   : > { %s2473_s24 = scalar_select %p1900_p11, 1, 0 }
  0x13   : > { %s2474_s25 = scalar_select %p1904_p12, 1, 0 }
  0x14   : > { %s2475_s26 = scalar_select %p1908_p13, 1, 0 }
  0x15   : > { %p1545_p1 = pneg %p1908_p13  ;;  %s132_s28 = sshll.u32 %s1809_s27, 4  ;;  %s133_s28 = int_to_ptr.vmem [resolvable:$true] %s132_s28 }
  0x16   : > { %p1562_p2 = scmp.lt.s32.totalorder %s1807_s15, 4  ;;  %s1810_s4 = smov [#allocation8]  }
  0x17   : > { %p1917_p0 = pnand %p1545_p1, %p2466_p4  ;;  %s142_s5 = sshll.u32 %s1810_s4, 4  ;;  %s1927_s5 = int_to_ptr.vmem [resolvable:$true] %s142_s5 }
  0x18   : > { %p1923_p3 = pnand %p1562_p2, %p1887_p5  ;;  %s1651_s8 = scalar_lea.hbm %s2463_s1, 64 }
  0x19   : > { %p1652_p7 = scmp.ne.s32.totalorder %s2463_s1, %s1651_s8  ;;  %p1653_p8 = pneg %p1917_p0 }
  0x1a   : > { %s2477_s30 = scalar_select %p1923_p3, 1, 0 }
  0x1b   : > { %p1654_p5 = pnand %p1653_p8, %p1652_p7  ;;  %p1658_p10 = scmp.lt.u32.totalorder %s1651_s8, %s2463_s1 }
  0x1d   : > { %p1655_p9 = pneg %p1654_p5 }
  0x1f   : > { %p1660_p1 = pnand %p1658_p10, %p1655_p9 }
  0x21   : > { %1663 = shalt.err (!%p1660_p1)
}
  0x22   : > { %s1664_s19 = scalar_lea.vmem %s133_s28, 64  ;;  %p1672_p11 = scmp.lt.s32.totalorder %s133_s28, %s133_s28 }
  0x23   : > { %p1665_p2 = scmp.ne.s32.totalorder %s133_s28, %s1664_s19  ;;  %p1673_p6 = scmp.lt.s32.totalorder %s1664_s19, %s1664_s19 }
  0x25   : > { %p1667_p4 = pnand %p1665_p2, %p1653_p8  ;;  %p1674_p13 = por %p1673_p6, %p1672_p11 }
  0x27   : > { %p1668_p12 = pneg %p1667_p4 }
  0x29   : > { %p1675_p3 = pnand %p1674_p13, %p1668_p12 }
  0x2b   : > { %1678 = shalt.err (!%p1675_p3)
}
  0x2c   : > { %1548 = dma.hbm_to_vmem [thread:$0]  (!%p1917_p0), %s2463_s1, 64, %s133_s28, [#allocation7]  }
  0x2d   : > { %s156_s27 = sand.u32 1, %s1803_s14   ;;  %s1679_s7 = scalar_lea.hbm %s2464_s2, 512 }
  0x2e   : > { %p1680_p4 = scmp.ne.s32.totalorder %s2464_s2, %s1679_s7  ;;  %p1686_p12 = scmp.lt.u32.totalorder %s1679_s7, %s2464_s2 }
  0x30   : > { %p1682_p6 = pnand %p1680_p4, %p1653_p8 }
  0x32   : > { %p1683_p11 = pneg %p1682_p6 }
  0x34   : > { %p1688_p13 = pnand %p1686_p12, %p1683_p11 }
  0x36   : > { %1691 = shalt.err (!%p1688_p13)
}
  0x37   : > { %s1692_s28 = scalar_lea.vmem %s1927_s5, 512  ;;  %p1700_p9 = scmp.lt.s32.totalorder %s1927_s5, %s1927_s5 }
  0x38   : > { %p1693_p3 = scmp.ne.s32.totalorder %s1927_s5, %s1692_s28  ;;  %p1701_p10 = scmp.lt.s32.totalorder %s1692_s28, %s1692_s28 }
  0x3a   : > { %p1695_p7 = pnand %p1693_p3, %p1653_p8  ;;  %p1702_p1 = por %p1701_p10, %p1700_p9 }
  0x3c   : > { %p1696_p5 = pneg %p1695_p7 }
  0x3e   : > { %p1703_p2 = pnand %p1702_p1, %p1696_p5 }
  0x40   : > { %1706 = shalt.err (!%p1703_p2)
}
  0x41   : > { %s1811_s17 = smov 256   ;;  %s1812_s19 = smov 16  }
  0x42   : > { %1551 = dma.hbm_to_vmem [thread:$0]  (!%p1917_p0), %s2464_s2, 512, %s1927_s5, [#allocation7], %s1811_s17, %s1811_s17, %s1812_s19  }
  0x43   : > { %s1408_s4 = sshll.u32 %s156_s27, 5  ;;  %s1494_s6 = sshll.u32 %s1807_s15, 9 }
  0x44   : > { %s1981_s9 = scalar_lea.hbm %s2462_s0, %s1494_s6  ;;  %s160_s10 = scalar_lea.vmem [#allocation3], %s1408_s4 }
  0x45   : > { %s168_s11 = sshll.u32 %s160_s10, 4  ;;  %s1985_s29 = scalar_lea.sflag [#allocation4], %s156_s27  ;;  %s1983_s11 = int_to_ptr.vmem [resolvable:$true] %s168_s11 }
  0x46   : > { %s1707_s28 = scalar_lea.hbm %s1981_s9, 512  ;;  %p2478_p0 = scmp.ne.s32.totalorder %s2477_s30, 0 }
  0x47   : > { %p1708_p8 = scmp.ne.s32.totalorder %s1981_s9, %s1707_s28  ;;  %s1712_s19 = scalar_lea.hbm %s2462_s0, 2048 }
  0x48   : > { %p1709_p4 = pneg %p2478_p0  ;;  %p1713_p12 = scmp.lt.u32.totalorder %s1981_s9, %s2462_s0 }
  0x49   : > { %p1714_p13 = scmp.lt.u32.totalorder %s1712_s19, %s1707_s28  ;;  %p1716_p7 = scmp.lt.u32.totalorder %s1707_s28, %s1981_s9 }
  0x4a   : > { %p1710_p6 = pnand %p1709_p4, %p1708_p8 }
  0x4b   : > { %p1715_p3 = por %p1714_p13, %p1713_p12 }
  0x4c   : > { %p1711_p11 = pneg %p1710_p6 }
  0x4d   : > { %p1717_p5 = por %p1716_p7, %p1715_p3 }
  0x4f   : > { %p1718_p9 = pnand %p1717_p5, %p1711_p11 }
  0x51   : > { %1721 = shalt.err (!%p1718_p9)
}
  0x52   : > { %s1722_s27 = scalar_lea.vmem %s1983_s11, 512  ;;  %s1813_s4 = smov [#allocation3]  }
  0x53   : > { %p1723_p10 = scmp.ne.s32.totalorder %s1983_s11, %s1722_s27  ;;  %s1727_s6 = sshll.u32 %s1813_s4, 4  ;;  %s1728_s6 = int_to_ptr.vmem [resolvable:$false] %s1727_s6 }
  0x54   : > { %s1729_s7 = scalar_lea.vmem %s1728_s6, 1024  ;;  %p1730_p8 = scmp.lt.s32.totalorder %s1983_s11, %s1728_s6 }
  0x55   : > { %p1725_p1 = pnand %p1723_p10, %p1709_p4  ;;  %p1731_p6 = scmp.lt.s32.totalorder %s1729_s7, %s1722_s27 }
  0x57   : > { %p1726_p2 = pneg %p1725_p1  ;;  %p1732_p12 = por %p1731_p6, %p1730_p8 }
  0x59   : > { %p1733_p13 = pnand %p1732_p12, %p1726_p2 }
  0x5b   : > { %1736 = shalt.err (!%p1733_p13)
}
  0x5c   : > { %s1814_s8 = smov 128   ;;  %s1815_s10 = smov 8  }
  0x5d   : > { %1555 = dma.hbm_to_vmem [thread:$0]  (!%p2478_p0), %s1981_s9, 512, %s1983_s11, %s1985_s29, %s1814_s8, %s1814_s8, %s1815_s10  }
  0x5e   : > { %p2479_p4 = scmp.ne.s32.totalorder %s2475_s26, 0 }
  0x5f   : > { %s2016_s28 = sand.u32 (!%p2479_p4), 1, %s1799_s13   ;;  %p2480_p11 = scmp.ne.s32.totalorder (!%p2479_p4), %s2472_s23, 0 }
  0x60   : > { %180 = sbr.rel (%p2479_p4) target bundleno = 597 (0x255), region = 32  ;;  %s1413_s5 = sshll.u32 (!%p2479_p4), %s2016_s28, 5 }
  0x61   : > { %s183_s17 = scalar_lea.sflag (!%p2479_p4), [#allocation4], %s2016_s28  ;;  %s2020_s19 = scalar_lea.vmem (!%p2479_p4), [#allocation3], %s1413_s5 }
  0x67   : > { %1782 = dma.done.wait (%p2480_p11), %s183_s17, 512  }
  0x68   : > { %1784 = vsyncadd (%p2480_p11), %s183_s17, 4294966784  ;;  %p2481_p0 = scmp.eq.s32.totalorder %s1869_s16, 0 }
  0x6a   : > { %1786 = dma.done.wait (%p2481_p0), [#allocation7], 576   ;;  %p2482_p3 = pmov %p2481_p0 }
  0x6b   : > { %v222_v0 = vld [vmem:[%s2020_s19 + $0x8] sm:$0xff]  ;;  %v221_v1 = vld [vmem:[%s2020_s19] sm:$0xff]  ;;  %s1816_s26 = smov 1   ;;  %s1817_s30 = smov 16   ;;  %vm946_vm0 = vcmask 1042434   ;;  %vm949_vm2 = vcmask 1046534   ;;  %v253_v18 = vlaneseq }
  0x6c   : > { %1788 = vsyncadd (%p2482_p3), [#allocation7], 4294966720  ;;  %490 = vrot.lane.b32.xlu1 %v222_v0, %s1816_s26  ;;  %320 = vrot.lane.b32.xlu0 %v221_v1, %s1817_s30  ;;  %v229_v2 = vcombine.high %v221_v1, %v221_v1  ;;  %v230_v3 = vcombine.high %v222_v0, %v222_v0  ;;  %s1818_s23 = smov 17   ;;  %s1819_s9 = smov 15   ;;  %vm947_vm1 = vsmask.f32 2304 }
  0x6d   : > { %s1820_s11 = smov 127   ;;  %s1821_s29 = smov 112   ;;  %vm950_vm3 = vsmask.f32 6400  ;;  %vm948_vm4 = vmand %vm946_vm0, %vm947_vm1  ;;  %v953_v6 = vld [vmem:[#allocation2 + $0x20] sm:$0x44] }
  0x6e   : > { %v1512_v4 = vpack.c.bf16 %v230_v3, %v222_v0  ;;  %v1511_v5 = vpack.c.bf16 %v229_v2, %v221_v1  ;;  %s1822_s20 = smov 113   ;;  %vm951_vm5 = vmand %vm949_vm2, %vm950_vm3  ;;  %v956_v7 = vld [vmem:[#allocation2 + $0x48] sm:$0x44]  ;;  %s1823_s22 = smov 111   ;;  %v223_v11 = vld [vmem:[%s2020_s19 + $0x10] sm:$0xff]  ;;  %v1824_v15 = vmov 0  }
  0x6f   : > { %vm2060_vm6 = vmor %vm951_vm5, %vm948_vm4  ;;  %v224_v12 = vld [vmem:[%s2020_s19 + $0x18] sm:$0xff]  ;;  %v2076_v13 = vcombine.high %v223_v11, %v223_v11  ;;  %1042 = vmatprep.mubr.bf16.mxu0 %v1824_v15  ;;  %1122 = vmatprep.mubr.bf16.mxu1 %v1824_v15  ;;  %v267_v19 = vshrl.u32 %v253_v18, 7  ;;  %v2120_v20 = vand.u32 127, %v253_v18  ;;  %v346_v23 = vld [vmem:[#allocation8 + $0x1] ss:$8 sm:$0x3] }
  0x70   : > { %322 = vrot.lane.b32.xlu0 %v222_v0, %s1817_s30  ;;  %328 = vrot.lane.b32.xlu1 %v229_v2, %s1817_s30  ;;  %607 = vst [vmem:[#allocation2 + $0x38] sm:$0x33] %v1512_v4  ;;  %606 = vst [vmem:[#allocation2 + $0x10] sm:$0x33] %v1511_v5  ;;  %v954_v9 = vsel %vm2060_vm6, 1065369472, %v953_v6  ;;  %v2078_v14 = vcombine.high %v224_v12, %v224_v12 }
  0x71   : > { %v957_v10 = vsel %vm2060_vm6, 1065369472, %v956_v7  ;;  %955 = vst [vmem:[#allocation2 + $0x20] sm:$0x44] %v954_v9  ;;  %v1513_v16 = vpack.c.bf16 %v2076_v13, %v223_v11  ;;  %v2122_v21 = vsub.s32 0, %v267_v19  ;;  %v2124_v22 = vsub.s32 1, %v267_v19 }
  0x72   : > { %958 = vst [vmem:[#allocation2 + $0x48] sm:$0x44] %v957_v10  ;;  %v1514_v17 = vpack.c.bf16 %v2078_v14, %v224_v12  ;;  %vm336_vm7 = vcmp.lt.s32.totalorder %v2120_v20, 16  ;;  %v959_v28 = vld [vmem:[#allocation2 + $0x70] sm:$0x44]  ;;  %vm504_vm8 = vcmp.lt.s32.totalorder %v2120_v20, 1 }
  0x73   : > { %608 = vst [vmem:[#allocation2 + $0x60] sm:$0x33] %v1513_v16  ;;  %v2132_v26 = vrot.slane %v346_v23, %v2122_v21  ;;  %v2135_v27 = vrot.slane %v346_v23, %v2124_v22  ;;  %v962_v29 = vld [vmem:[#allocation2 + $0x98] sm:$0x44]  ;;  %v960_v32 = vsel %vm2060_vm6, 1065369472, %v959_v28 }
  0x74   : > { %488 = vrot.lane.b32.xlu0 %v221_v1, %s1816_s26  ;;  %330 = vrot.lane.b32.xlu1 %v230_v3, %s1817_s30  ;;  %609 = vst [vmem:[#allocation2 + $0x88] sm:$0x33] %v1514_v17  ;;  %v963_v33 = vsel %vm2060_vm6, 1065369472, %v962_v29  ;;  %961 = vst [vmem:[#allocation2 + $0x70] sm:$0x44] %v960_v32 }
  0x75   : > { %964 = vst [vmem:[#allocation2 + $0x98] sm:$0x44] %v963_v33  ;;  %v514_v38 = vld [vmem:[#allocation8 + $0x3] ss:$8 sm:$0x3]  ;;  %vm255_vm9 = vcmp.lt.s32.totalorder %v2120_v20, 17 }
  0x76   : > { %v2155_v44 = vrot.slane %v514_v38, %v2122_v21  ;;  %v2164_v48 = vrot.slane %v514_v38, %v2124_v22  ;;  %v264_v61 = vld [vmem:[#allocation8] ss:$8 sm:$0x3]  ;;  %v432_v17 = vld [vmem:[#allocation8 + $0x2] ss:$8 sm:$0x3] }
  0x77   : > { %v2183_v4 = vrot.slane %v264_v61, %v2124_v22  ;;  %vm422_vm10 = vcmp.lt.s32.totalorder %v2120_v20, 15  ;;  %v2202_v28 = vrot.slane %v432_v17, %v2124_v22  ;;  %vm626_vm11 = vcmp.lt.s32.totalorder %v2120_v20, 127  ;;  %s1416_s27 = sshll.u32 %s2016_s28, 6  ;;  %s1532_s7 = sshll.u32 %s1869_s16, 10 }
  0x78   : > { %496 = vrot.lane.b32.xlu0 %v229_v2, %s1816_s26  ;;  %498 = vrot.lane.b32.xlu1 %v230_v3, %s1816_s26  ;;  %vm794_vm12 = vcmp.lt.s32.totalorder %v2120_v20, 112  ;;  %vm712_vm13 = vcmp.lt.s32.totalorder %v2120_v20, 113  ;;  %vm880_vm14 = vcmp.lt.s32.totalorder %v2120_v20, 111  ;;  %vm1000_vm15 = vcmask 1041408   ;;  %s216_s4 = scalar_lea.vmem [#allocation9], %s1416_s27  ;;  %s2418_s5 = scalar_lea.hbm %s2465_s3, %s1532_s7 }
  0x79   : > { %vm1001_vm0 = vcmask 1042432   ;;  %vm996_vm1 = vcmask 302080   ;;  %s1311_s6 = sshll.u32 %s216_s4, 4  ;;  %s1297_s16 = scalar_lea.sflag [#allocation5], %s2016_s28  ;;  %s2413_s6 = int_to_ptr.vmem [resolvable:$true] %s1311_s6 }
  0x7a   : > { %s1737_s17 = scalar_lea.vmem %s2413_s6, 1024  ;;  %p2485_p5 = scmp.ne.s32.totalorder %s2473_s24, 0 }
  0x7b   : > { %p1738_p7 = scmp.ne.s32.totalorder %s2413_s6, %s1737_s17  ;;  %s1826_s19 = smov [#allocation9]  }
  0x7c   : > { %237 = vrot.lane.b32.xlu0 %v221_v1, %s1818_s23  ;;  %239 = vrot.lane.b32.xlu1 %v222_v0, %s1818_s23 }
  0x7d   : > { %p1739_p9 = pnand %p1738_p7, %p2485_p5 }
  0x7f   : > { %p1740_p10 = pneg %p1739_p9 }
  0x80   : > { %245 = vrot.lane.b32.xlu0 %v229_v2, %s1818_s23  ;;  %247 = vrot.lane.b32.xlu1 %v230_v3, %s1818_s23 }
  0x84   : > { %406 = vrot.lane.b32.xlu0 %v221_v1, %s1819_s9  ;;  %408 = vrot.lane.b32.xlu1 %v222_v0, %s1819_s9 }
  0x88   : > { %414 = vrot.lane.b32.xlu0 %v229_v2, %s1819_s9  ;;  %416 = vrot.lane.b32.xlu1 %v230_v3, %s1819_s9 }
  0x8c   : > { %610 = vrot.lane.b32.xlu0 %v221_v1, %s1820_s11  ;;  %612 = vrot.lane.b32.xlu1 %v222_v0, %s1820_s11 }
  0x90   : > { %618 = vrot.lane.b32.xlu0 %v229_v2, %s1820_s11  ;;  %620 = vrot.lane.b32.xlu1 %v230_v3, %s1820_s11 }
  0x94   : > { %778 = vrot.lane.b32.xlu0 %v221_v1, %s1821_s29  ;;  %780 = vrot.lane.b32.xlu1 %v222_v0, %s1821_s29 }
  0x98   : > { %786 = vrot.lane.b32.xlu0 %v229_v2, %s1821_s29  ;;  %788 = vrot.lane.b32.xlu1 %v230_v3, %s1821_s29 }
  0x9c   : > { %696 = vrot.lane.b32.xlu0 %v221_v1, %s1822_s20  ;;  %698 = vrot.lane.b32.xlu1 %v222_v0, %s1822_s20 }
  0xa0   : > { %704 = vrot.lane.b32.xlu0 %v229_v2, %s1822_s20  ;;  %706 = vrot.lane.b32.xlu1 %v230_v3, %s1822_s20 }
  0xa4   : > { %864 = vrot.lane.b32.xlu0 %v221_v1, %s1823_s22  ;;  %866 = vrot.lane.b32.xlu1 %v222_v0, %s1823_s22 }
  0xa8   : > { %872 = vrot.lane.b32.xlu0 %v229_v2, %s1823_s22  ;;  %874 = vrot.lane.b32.xlu1 %v230_v3, %s1823_s22  ;;  %v2180_v3 = vrot.slane %v264_v61, %v2122_v21 }
  0xac   : > { %324 = vrot.lane.b32.xlu0 %v223_v11, %s1817_s30  ;;  %326 = vrot.lane.b32.xlu1 %v224_v12, %s1817_s30 }
  0xb0   : > { %332 = vrot.lane.b32.xlu0 %v2076_v13, %s1817_s30  ;;  %334 = vrot.lane.b32.xlu1 %v2078_v14, %s1817_s30 }
  0xb4   : > { %492 = vrot.lane.b32.xlu0 %v223_v11, %s1816_s26  ;;  %494 = vrot.lane.b32.xlu1 %v224_v12, %s1816_s26 }
  0xb8   : > { %500 = vrot.lane.b32.xlu0 %v2076_v13, %s1816_s26  ;;  %502 = vrot.lane.b32.xlu1 %v2078_v14, %s1816_s26  ;;  %s1741_s26 = sshll.u32 %s1826_s19, 4  ;;  %s1742_s26 = int_to_ptr.vmem [resolvable:$false] %s1741_s26 }
  0xb9   : > { %p1744_p1 = scmp.lt.s32.totalorder %s2413_s6, %s1742_s26 }
  0xbc   : > { %241 = vrot.lane.b32.xlu0 %v223_v11, %s1818_s23  ;;  %243 = vrot.lane.b32.xlu1 %v224_v12, %s1818_s23 }
  0xc0   : > { %249 = vrot.lane.b32.xlu0 %v2076_v13, %s1818_s23  ;;  %251 = vrot.lane.b32.xlu1 %v2078_v14, %s1818_s23  ;;  %s1743_s23 = scalar_lea.vmem %s1742_s26, 2048 }
  0xc1   : > { %p1745_p2 = scmp.lt.s32.totalorder %s1743_s23, %s1737_s17 }
  0xc3   : > { %p1746_p8 = por %p1745_p2, %p1744_p1 }
  0xc4   : > { %410 = vrot.lane.b32.xlu0 %v223_v11, %s1819_s9  ;;  %412 = vrot.lane.b32.xlu1 %v224_v12, %s1819_s9 }
  0xc5   : > { %p1747_p6 = pnand %p1746_p8, %p1740_p10 }
  0xc8   : > { %418 = vrot.lane.b32.xlu0 %v2076_v13, %s1819_s9  ;;  %420 = vrot.lane.b32.xlu1 %v2078_v14, %s1819_s9 }
  0xcc   : > { %614 = vrot.lane.b32.xlu0 %v223_v11, %s1820_s11  ;;  %616 = vrot.lane.b32.xlu1 %v224_v12, %s1820_s11 }
  0xd0   : > { %622 = vrot.lane.b32.xlu0 %v2076_v13, %s1820_s11  ;;  %624 = vrot.lane.b32.xlu1 %v2078_v14, %s1820_s11 }
  0xd4   : > { %782 = vrot.lane.b32.xlu0 %v223_v11, %s1821_s29  ;;  %784 = vrot.lane.b32.xlu1 %v224_v12, %s1821_s29 }
  0xd8   : > { %790 = vrot.lane.b32.xlu0 %v2076_v13, %s1821_s29  ;;  %792 = vrot.lane.b32.xlu1 %v2078_v14, %s1821_s29 }
  0xdc   : > { %700 = vrot.lane.b32.xlu0 %v223_v11, %s1822_s20  ;;  %702 = vrot.lane.b32.xlu1 %v224_v12, %s1822_s20 }
  0xde   : > { %v491_v24 = vpop.permute.xlu1 %490  ;;  %v321_v25 = vpop.permute.xlu0 %320 }
  0xe0   : > { %708 = vrot.lane.b32.xlu0 %v2076_v13, %s1822_s20  ;;  %710 = vrot.lane.b32.xlu1 %v2078_v14, %s1822_s20 }
  0xe2   : > { %v323_v30 = vpop.permute.xlu0 %322  ;;  %v329_v31 = vpop.permute.xlu1 %328 }
  0xe3   : > { %v337_v34 = vsel %vm336_vm7, %v321_v25, %v329_v31  ;;  %v341_v35 = vsel %vm336_vm7, %v329_v31, %v321_v25  ;;  %v2199_v25 = vrot.slane %v432_v17, %v2122_v21 }
  0xe4   : > { %v358_v36 = vmul.f32 %v2132_v26, %v341_v35  ;;  %v359_v37 = vmul.f32 %v2135_v27, %v337_v34  ;;  %868 = vrot.lane.b32.xlu0 %v223_v11, %s1823_s22  ;;  %870 = vrot.lane.b32.xlu1 %v224_v12, %s1823_s22 }
  0xe6   : > { %v1499_v39 = vpack.c.bf16 %v359_v37, %v358_v36  ;;  %v489_v40 = vpop.permute.xlu0 %488  ;;  %v331_v41 = vpop.permute.xlu1 %330 }
  0xe7   : > { %v338_v42 = vsel %vm336_vm7, %v323_v30, %v331_v41  ;;  %v342_v43 = vsel %vm336_vm7, %v331_v41, %v323_v30 }
  0xe8   : > { %v394_v45 = vrot.slane %v1499_v39, 6  ;;  %v360_v46 = vmul.f32 %v2132_v26, %v342_v43  ;;  %v361_v47 = vmul.f32 %v2135_v27, %v338_v42  ;;  %876 = vrot.lane.b32.xlu0 %v2076_v13, %s1823_s22  ;;  %878 = vrot.lane.b32.xlu1 %v2078_v14, %s1823_s22  ;;  %v636_v39 = vld [vmem:[#allocation8 + $0x5] ss:$8 sm:$0x3] }
  0xea   : > { %402 = vst [vmem:[#allocation2] sm:$0xcc] %v394_v45  ;;  %v1500_v49 = vpack.c.bf16 %v361_v47, %v360_v46  ;;  %v497_v50 = vpop.permute.xlu0 %496  ;;  %v499_v51 = vpop.permute.xlu1 %498  ;;  %v2218_v45 = vrot.slane %v636_v39, %v2122_v21  ;;  %v2221_v46 = vrot.slane %v636_v39, %v2124_v22 }
  0xeb   : > { %v505_v52 = vsel %vm504_vm8, %v489_v40, %v497_v50  ;;  %v509_v53 = vsel %vm504_vm8, %v497_v50, %v489_v40  ;;  %v506_v54 = vsel %vm504_vm8, %v491_v24, %v499_v51  ;;  %v510_v55 = vsel %vm504_vm8, %v499_v51, %v491_v24 }
  0xec   : > { %v395_v56 = vrot.slane %v1500_v49, 6  ;;  %v526_v57 = vmul.f32 %v2155_v44, %v509_v53  ;;  %v527_v58 = vmul.f32 %v2164_v48, %v505_v52  ;;  %v528_v59 = vmul.f32 %v2155_v44, %v510_v55 }
  0xed   : > { %v529_v60 = vmul.f32 %v2164_v48, %v506_v54 }
  0xee   : > { %403 = vst [vmem:[#allocation2 + $0x28] sm:$0xcc] %v395_v56  ;;  %v1507_v62 = vpack.c.bf16 %v527_v58, %v526_v57  ;;  %v238_v63 = vpop.permute.xlu0 %237  ;;  %v240_v0 = vpop.permute.xlu1 %239  ;;  %v804_v58 = vld [vmem:[#allocation8 + $0x7] ss:$8 sm:$0x3] }
  0xef   : > { %v1508_v1 = vpack.c.bf16 %v529_v60, %v528_v59 }
  0xf0   : > { %v562_v2 = vrot.slane %v1507_v62, 6 }
  0xf1   : > { %v563_v5 = vrot.slane %v1508_v1, 6 }
  0xf2   : > { %570 = vst [vmem:[#allocation2 + $0x8] sm:$0xcc] %v562_v2  ;;  %v246_v6 = vpop.permute.xlu0 %245  ;;  %v248_v7 = vpop.permute.xlu1 %247  ;;  %v2237_v2 = vrot.slane %v804_v58, %v2122_v21 }
  0xf3   : > { %571 = vst [vmem:[#allocation2 + $0x30] sm:$0xcc] %v563_v5  ;;  %v256_v8 = vsel %vm255_vm9, %v238_v63, %v246_v6  ;;  %v260_v9 = vsel %vm255_vm9, %v246_v6, %v238_v63  ;;  %v257_v10 = vsel %vm255_vm9, %v240_v0, %v248_v7  ;;  %v261_v11 = vsel %vm255_vm9, %v248_v7, %v240_v0 }
  0xf4   : > { %v276_v12 = vmul.f32 %v2180_v3, %v260_v9  ;;  %v277_v13 = vmul.f32 %v2183_v4, %v256_v8  ;;  %v278_v14 = vmul.f32 %v2180_v3, %v261_v11  ;;  %v279_v16 = vmul.f32 %v2183_v4, %v257_v10 }
  0xf5   : > { %v2240_v5 = vrot.slane %v804_v58, %v2124_v22 }
  0xf6   : > { %v1495_v18 = vpack.c.bf16 %v277_v13, %v276_v12  ;;  %v1496_v19 = vpack.c.bf16 %v279_v16, %v278_v14  ;;  %v407_v23 = vpop.permute.xlu0 %406  ;;  %v409_v24 = vpop.permute.xlu1 %408 }
  0xf8   : > { %316 = vst [vmem:[#allocation2] sm:$0x33] %v1495_v18  ;;  %317 = vst [vmem:[#allocation2 + $0x28] sm:$0x33] %v1496_v19 }
  0xfa   : > { %v415_v29 = vpop.permute.xlu0 %414  ;;  %v417_v30 = vpop.permute.xlu1 %416 }
  0xfb   : > { %v423_v31 = vsel %vm422_vm10, %v407_v23, %v415_v29  ;;  %v427_v32 = vsel %vm422_vm10, %v415_v29, %v407_v23  ;;  %v424_v33 = vsel %vm422_vm10, %v409_v24, %v417_v30  ;;  %v428_v34 = vsel %vm422_vm10, %v417_v30, %v409_v24  ;;  %v722_v23 = vld [vmem:[#allocation8 + $0x6] ss:$8 sm:$0x3] }
  0xfc   : > { %v444_v35 = vmul.f32 %v2199_v25, %v427_v32  ;;  %v445_v36 = vmul.f32 %v2202_v28, %v423_v31  ;;  %v446_v37 = vmul.f32 %v2199_v25, %v428_v34  ;;  %v447_v38 = vmul.f32 %v2202_v28, %v424_v33 }
  0xfd   : > { %v2256_v34 = vrot.slane %v722_v23, %v2122_v21 }
  0xfe   : > { %v1503_v40 = vpack.c.bf16 %v445_v36, %v444_v35  ;;  %v1504_v41 = vpack.c.bf16 %v447_v38, %v446_v37  ;;  %v611_v42 = vpop.permute.xlu0 %610  ;;  %v613_v43 = vpop.permute.xlu1 %612  ;;  %v2259_v35 = vrot.slane %v722_v23, %v2124_v22 }
 0x100   : > { %484 = vst [vmem:[#allocation2 + $0x8] sm:$0x33] %v1503_v40  ;;  %485 = vst [vmem:[#allocation2 + $0x30] sm:$0x33] %v1504_v41 }
 0x102   : > { %v619_v47 = vpop.permute.xlu0 %618  ;;  %v621_v49 = vpop.permute.xlu1 %620 }
 0x103   : > { %v627_v50 = vsel %vm626_vm11, %v611_v42, %v619_v47  ;;  %v631_v51 = vsel %vm626_vm11, %v619_v47, %v611_v42  ;;  %v628_v52 = vsel %vm626_vm11, %v613_v43, %v621_v49  ;;  %v632_v53 = vsel %vm626_vm11, %v621_v49, %v613_v43 }
 0x104   : > { %v648_v54 = vmul.f32 %v2218_v45, %v627_v50  ;;  %v649_v55 = vmul.f32 %v2221_v46, %v631_v51  ;;  %v650_v56 = vmul.f32 %v2218_v45, %v628_v52  ;;  %v651_v57 = vmul.f32 %v2221_v46, %v632_v53  ;;  %v890_v50 = vld [vmem:[#allocation8 + $0x10] ss:$8 sm:$0x3] }
 0x106   : > { %v1515_v59 = vpack.c.bf16 %v649_v55, %v648_v54  ;;  %v1516_v60 = vpack.c.bf16 %v651_v57, %v650_v56  ;;  %v779_v61 = vpop.permute.xlu0 %778  ;;  %v781_v62 = vpop.permute.xlu1 %780  ;;  %v2275_v55 = vrot.slane %v890_v50, %v2122_v21  ;;  %v2278_v56 = vrot.slane %v890_v50, %v2124_v22 }
 0x107   : > { %v1619_v63 = vld [vmem:[#allocation2 + $0x4] ss:$8 sps:$4 sm:$0xff]   ;;  %v1623_v7 = vld [vmem:[#allocation2] ss:$8 sps:$4 sm:$0xff]  }
 0x108   : > { %v684_v0 = vrot.slane %v1515_v59, 6  ;;  %v685_v1 = vrot.slane %v1516_v60, 6  ;;  %v1621_v6 = vld [vmem:[#allocation2 + $0x2c] ss:$8 sps:$4 sm:$0xff]   ;;  %1010 = vmatprep.subr.bf16.mxu0 %v1619_v63  ;;  %v1624_v8 = vld [vmem:[#allocation2 + $0x28] ss:$8 sps:$4 sm:$0xff]  }
 0x109   : > { %1090 = vmatprep.subr.bf16.mxu1 %v1621_v6  ;;  %1011 = vmatpush1.bf16.msra.mxu0 %v1623_v7 }
 0x10a   : > { %692 = vst [vmem:[#allocation2 + $0x10] sm:$0xcc] %v684_v0  ;;  %693 = vst [vmem:[#allocation2 + $0x38] sm:$0xcc] %v685_v1  ;;  %v787_v9 = vpop.permute.xlu0 %786  ;;  %v789_v10 = vpop.permute.xlu1 %788  ;;  %1091 = vmatpush1.bf16.msra.mxu1 %v1624_v8 }
 0x10b   : > { %v795_v11 = vsel %vm794_vm12, %v779_v61, %v787_v9  ;;  %v799_v12 = vsel %vm794_vm12, %v787_v9, %v779_v61  ;;  %v796_v13 = vsel %vm794_vm12, %v781_v62, %v789_v10  ;;  %v800_v14 = vsel %vm794_vm12, %v789_v10, %v781_v62 }
 0x10c   : > { %v816_v16 = vmul.f32 %v2237_v2, %v795_v11  ;;  %v817_v17 = vmul.f32 %v2240_v5, %v799_v12  ;;  %v818_v18 = vmul.f32 %v2237_v2, %v796_v13  ;;  %v819_v19 = vmul.f32 %v2240_v5, %v800_v14 }
 0x10e   : > { %v1523_v24 = vpack.c.bf16 %v817_v17, %v816_v16  ;;  %v1524_v29 = vpack.c.bf16 %v819_v19, %v818_v18  ;;  %v697_v30 = vpop.permute.xlu0 %696  ;;  %v699_v31 = vpop.permute.xlu1 %698  ;;  %v1825_v16 = vmov 65535  }
 0x10f   : > { %v1002_v17 = vsel %vm1000_vm15, 4294967295, %v1825_v16 }
 0x110   : > { %v852_v32 = vrot.slane %v1523_v24, 6  ;;  %v853_v33 = vrot.slane %v1524_v29, 6 }
 0x112   : > { %860 = vst [vmem:[#allocation2 + $0x18] sm:$0xcc] %v852_v32  ;;  %861 = vst [vmem:[#allocation2 + $0x40] sm:$0xcc] %v853_v33  ;;  %v705_v36 = vpop.permute.xlu0 %704  ;;  %v707_v37 = vpop.permute.xlu1 %706 }
 0x113   : > { %v713_v38 = vsel %vm712_vm13, %v697_v30, %v705_v36  ;;  %v717_v39 = vsel %vm712_vm13, %v705_v36, %v697_v30  ;;  %v714_v40 = vsel %vm712_vm13, %v699_v31, %v707_v37  ;;  %v718_v41 = vsel %vm712_vm13, %v707_v37, %v699_v31 }
 0x114   : > { %v734_v42 = vmul.f32 %v2256_v34, %v713_v38  ;;  %v735_v43 = vmul.f32 %v2259_v35, %v717_v39  ;;  %v736_v47 = vmul.f32 %v2256_v34, %v714_v40  ;;  %v737_v49 = vmul.f32 %v2259_v35, %v718_v41 }
 0x115   : > { %v2305_v40 = vsel %vm1001_vm0, %v1002_v17, 0 }
 0x116   : > { %v1519_v51 = vpack.c.bf16 %v735_v43, %v734_v42  ;;  %v1520_v52 = vpack.c.bf16 %v737_v49, %v736_v47  ;;  %v865_v53 = vpop.permute.xlu0 %864  ;;  %v867_v54 = vpop.permute.xlu1 %866 }
 0x118   : > { %774 = vst [vmem:[#allocation2 + $0x18] sm:$0x33] %v1519_v51  ;;  %775 = vst [vmem:[#allocation2 + $0x40] sm:$0x33] %v1520_v52 }
 0x11a   : > { %v873_v57 = vpop.permute.xlu0 %872  ;;  %v875_v58 = vpop.permute.xlu1 %874 }
 0x11b   : > { %v881_v59 = vsel %vm880_vm14, %v865_v53, %v873_v57  ;;  %v885_v60 = vsel %vm880_vm14, %v873_v57, %v865_v53  ;;  %v882_v61 = vsel %vm880_vm14, %v867_v54, %v875_v58  ;;  %v886_v62 = vsel %vm880_vm14, %v875_v58, %v867_v54 }
 0x11c   : > { %v902_v21 = vmul.f32 %v2275_v55, %v881_v59  ;;  %v903_v63 = vmul.f32 %v2278_v56, %v885_v60  ;;  %v904_v22 = vmul.f32 %v2275_v55, %v882_v61  ;;  %v905_v0 = vmul.f32 %v2278_v56, %v886_v62 }
 0x11e   : > { %v1527_v1 = vpack.c.bf16 %v903_v63, %v902_v21  ;;  %v1528_v6 = vpack.c.bf16 %v905_v0, %v904_v22  ;;  %v325_v7 = vpop.permute.xlu0 %324  ;;  %v327_v8 = vpop.permute.xlu1 %326 }
 0x11f   : > { %v1625_v9 = vld [vmem:[#allocation2 + $0x3c] ss:$8 sps:$4 sm:$0xff]   ;;  %v1629_v11 = vld [vmem:[#allocation2 + $0x10] ss:$8 sps:$4 sm:$0xff]  }
 0x120   : > { %942 = vst [vmem:[#allocation2 + $0x20] sm:$0x33] %v1527_v1  ;;  %943 = vst [vmem:[#allocation2 + $0x48] sm:$0x33] %v1528_v6  ;;  %v1627_v10 = vld [vmem:[#allocation2 + $0x14] ss:$8 sps:$4 sm:$0xff]   ;;  %1092 = vmatprep.subr.bf16.mxu1 %v1625_v9 }
 0x121   : > { %v1630_v12 = vld [vmem:[#allocation2 + $0x38] ss:$8 sps:$4 sm:$0xff]   ;;  %1012 = vmatprep.subr.bf16.mxu0 %v1627_v10 }
 0x122   : > { %v333_v13 = vpop.permute.xlu0 %332  ;;  %v335_v14 = vpop.permute.xlu1 %334  ;;  %1093 = vmatpush1.bf16.msra.mxu1 %v1630_v12  ;;  %1013 = vmatpush1.bf16.msra.mxu0 %v1629_v11 }
 0x123   : > { %v339_v18 = vsel %vm336_vm7, %v325_v7, %v333_v13  ;;  %v343_v19 = vsel %vm336_vm7, %v333_v13, %v325_v7  ;;  %v340_v23 = vsel %vm336_vm7, %v327_v8, %v335_v14  ;;  %v344_v24 = vsel %vm336_vm7, %v335_v14, %v327_v8  ;;  %v2323_v8 = vld [vmem:[#allocation6] sm:$0xf] }
 0x124   : > { %v362_v29 = vmul.f32 %v2132_v26, %v343_v19  ;;  %v363_v30 = vmul.f32 %v2135_v27, %v339_v18  ;;  %v364_v31 = vmul.f32 %v2132_v26, %v344_v24  ;;  %v365_v32 = vmul.f32 %v2135_v27, %v340_v23 }
 0x126   : > { %v1501_v33 = vpack.c.bf16 %v363_v30, %v362_v29  ;;  %v1502_v36 = vpack.c.bf16 %v365_v32, %v364_v31  ;;  %v493_v37 = vpop.permute.xlu0 %492  ;;  %v495_v38 = vpop.permute.xlu1 %494 }
 0x127   : > { %v970_v39 = vld [vmem:[#allocation2 + $0x20] sm:$0x77]  ;;  %v1058_v41 = vld [vmem:[#allocation2 + $0x48] sm:$0x77] }
 0x128   : > { %v396_v42 = vrot.slane %v1501_v33, 6  ;;  %v397_v43 = vrot.slane %v1502_v36, 6  ;;  %v1458_v47 = vcombine.high %v970_v39, %v970_v39  ;;  %v1465_v49 = vcombine.high %v1058_v41, %v1058_v41 }
 0x129   : > { %v1457_v50 = vcombine.low %v970_v39, %v970_v39  ;;  %v1464_v51 = vcombine.low %v1058_v41, %v1058_v41 }
 0x12a   : > { %404 = vst [vmem:[#allocation2 + $0x50] sm:$0xcc] %v396_v42  ;;  %405 = vst [vmem:[#allocation2 + $0x78] sm:$0xcc] %v397_v43  ;;  %v501_v26 = vpop.permute.xlu0 %500  ;;  %v503_v52 = vpop.permute.xlu1 %502  ;;  %v1008_v27 = vand.u32 %v1458_v47, %v2305_v40  ;;  %v1088_v53 = vand.u32 %v1465_v49, %v2305_v40 }
 0x12b   : > { %v507_v54 = vsel %vm504_vm8, %v493_v37, %v501_v26  ;;  %v511_v57 = vsel %vm504_vm8, %v501_v26, %v493_v37  ;;  %v508_v58 = vsel %vm504_vm8, %v495_v38, %v503_v52  ;;  %v512_v59 = vsel %vm504_vm8, %v503_v52, %v495_v38 }
 0x12c   : > { %v530_v60 = vmul.f32 %v2155_v44, %v511_v57  ;;  %v531_v61 = vmul.f32 %v2164_v48, %v507_v54  ;;  %v532_v62 = vmul.f32 %v2155_v44, %v512_v59  ;;  %v533_v21 = vmul.f32 %v2164_v48, %v508_v58  ;;  %1014 = vmatprep.subr.bf16.mxu0 %v1008_v27 }
 0x12d   : > { %1094 = vmatprep.subr.bf16.mxu1 %v1088_v53  ;;  %v1005_v63 = vand.u32 %v1457_v50, %v2305_v40  ;;  %v1085_v22 = vand.u32 %v1464_v51, %v2305_v40 }
 0x12e   : > { %v1509_v0 = vpack.c.bf16 %v531_v61, %v530_v60  ;;  %v1510_v1 = vpack.c.bf16 %v533_v21, %v532_v62  ;;  %v242_v6 = vpop.permute.xlu0 %241  ;;  %v244_v7 = vpop.permute.xlu1 %243 }
 0x12f   : > { %1015 = vmatpush1.bf16.msra.mxu0 %v1005_v63  ;;  %1095 = vmatpush1.bf16.msra.mxu1 %v1085_v22 }
 0x130   : > { %v564_v9 = vrot.slane %v1509_v0, 6  ;;  %v565_v10 = vrot.slane %v1510_v1, 6 }
 0x132   : > { %572 = vst [vmem:[#allocation2 + $0x58] sm:$0xcc] %v564_v9  ;;  %573 = vst [vmem:[#allocation2 + $0x80] sm:$0xcc] %v565_v10  ;;  %v250_v44 = vpop.permute.xlu0 %249  ;;  %v252_v48 = vpop.permute.xlu1 %251  ;;  %1459 = vmatmul.mubr.msk.bf16.vlgmr.msra.gmra.mrb[0].mxu0 %vm996_vm1, %v2323_v8  ;;  %1466 = vmatmul.mubr.msk.bf16.vlgmr.msra.gmra.mrb[0].mxu1 %vm996_vm1, %v2323_v8 }
 0x133   : > { %v258_v11 = vsel %vm255_vm9, %v242_v6, %v250_v44  ;;  %v262_v12 = vsel %vm255_vm9, %v250_v44, %v242_v6  ;;  %v259_v13 = vsel %vm255_vm9, %v244_v7, %v252_v48  ;;  %v263_v14 = vsel %vm255_vm9, %v252_v48, %v244_v7  ;;  %1203 = vmatprep.mubr.bf16.mxu0 %v1824_v15 }
 0x134   : > { %v280_v16 = vmul.f32 %v2180_v3, %v262_v12  ;;  %v281_v17 = vmul.f32 %v2183_v4, %v258_v11  ;;  %v282_v18 = vmul.f32 %v2180_v3, %v263_v14  ;;  %v283_v19 = vmul.f32 %v2183_v4, %v259_v13  ;;  %1284 = vmatprep.mubr.bf16.mxu1 %v1824_v15 }
 0x136   : > { %v1497_v23 = vpack.c.bf16 %v281_v17, %v280_v16  ;;  %v1498_v24 = vpack.c.bf16 %v283_v19, %v282_v18  ;;  %v411_v29 = vpop.permute.xlu0 %410  ;;  %v413_v30 = vpop.permute.xlu1 %412 }
 0x138   : > { %318 = vst [vmem:[#allocation2 + $0x50] sm:$0x33] %v1497_v23  ;;  %319 = vst [vmem:[#allocation2 + $0x78] sm:$0x33] %v1498_v24 }
 0x13a   : > { %v419_v31 = vpop.permute.xlu0 %418  ;;  %v421_v32 = vpop.permute.xlu1 %420 }
 0x13b   : > { %v425_v33 = vsel %vm422_vm10, %v411_v29, %v419_v31  ;;  %v429_v36 = vsel %vm422_vm10, %v419_v31, %v411_v29  ;;  %v426_v3 = vsel %vm422_vm10, %v413_v30, %v421_v32  ;;  %v430_v15 = vsel %vm422_vm10, %v421_v32, %v413_v30 }
 0x13c   : > { %v448_v4 = vmul.f32 %v2199_v25, %v429_v36  ;;  %v449_v37 = vmul.f32 %v2202_v28, %v425_v33  ;;  %v450_v38 = vmul.f32 %v2199_v25, %v430_v15  ;;  %v451_v39 = vmul.f32 %v2202_v28, %v426_v3 }
 0x13e   : > { %v1505_v41 = vpack.c.bf16 %v449_v37, %v448_v4  ;;  %v1506_v42 = vpack.c.bf16 %v451_v39, %v450_v38  ;;  %v615_v43 = vpop.permute.xlu0 %614  ;;  %v617_v47 = vpop.permute.xlu1 %616 }
 0x140   : > { %486 = vst [vmem:[#allocation2 + $0x58] sm:$0x33] %v1505_v41  ;;  %487 = vst [vmem:[#allocation2 + $0x80] sm:$0x33] %v1506_v42 }
 0x142   : > { %v623_v49 = vpop.permute.xlu0 %622  ;;  %v625_v50 = vpop.permute.xlu1 %624 }
 0x143   : > { %v629_v51 = vsel %vm626_vm11, %v615_v43, %v623_v49  ;;  %v633_v26 = vsel %vm626_vm11, %v623_v49, %v615_v43  ;;  %v630_v52 = vsel %vm626_vm11, %v617_v47, %v625_v50  ;;  %v634_v25 = vsel %vm626_vm11, %v625_v50, %v617_v47 }
 0x144   : > { %v652_v28 = vmul.f32 %v2218_v45, %v629_v51  ;;  %v653_v27 = vmul.f32 %v2221_v46, %v633_v26  ;;  %v654_v53 = vmul.f32 %v2218_v45, %v630_v52  ;;  %v655_v54 = vmul.f32 %v2221_v46, %v634_v25 }
 0x146   : > { %v1517_v57 = vpack.c.bf16 %v653_v27, %v652_v28  ;;  %v1518_v58 = vpack.c.bf16 %v655_v54, %v654_v53  ;;  %v783_v59 = vpop.permute.xlu0 %782  ;;  %v785_v60 = vpop.permute.xlu1 %784 }
 0x147   : > { %v1635_v61 = vld [vmem:[#allocation2 + $0x78] ss:$8 sps:$4 sm:$0xff]   ;;  %v1637_v62 = vld [vmem:[#allocation2 + $0x7c] ss:$8 sps:$4 sm:$0xff]  }
 0x148   : > { %v686_v21 = vrot.slane %v1517_v57, 6  ;;  %v687_v63 = vrot.slane %v1518_v58, 6  ;;  %v1638_v22 = vld [vmem:[#allocation2 + $0x50] ss:$8 sps:$4 sm:$0xff]   ;;  %1252 = vmatprep.subr.bf16.mxu1 %v1637_v62  ;;  %v1640_v0 = vld [vmem:[#allocation2 + $0x54] ss:$8 sps:$4 sm:$0xff]  }
 0x149   : > { %1253 = vmatpush1.bf16.msra.mxu1 %v1635_v61  ;;  %1171 = vmatprep.subr.bf16.mxu0 %v1640_v0 }
 0x14a   : > { %694 = vst [vmem:[#allocation2 + $0x60] sm:$0xcc] %v686_v21  ;;  %695 = vst [vmem:[#allocation2 + $0x88] sm:$0xcc] %v687_v63  ;;  %v791_v1 = vpop.permute.xlu0 %790  ;;  %v793_v6 = vpop.permute.xlu1 %792  ;;  %1172 = vmatpush1.bf16.msra.mxu0 %v1638_v22 }
 0x14b   : > { %v797_v45 = vsel %vm794_vm12, %v783_v59, %v791_v1  ;;  %v801_v46 = vsel %vm794_vm12, %v791_v1, %v783_v59  ;;  %v798_v7 = vsel %vm794_vm12, %v785_v60, %v793_v6  ;;  %v802_v9 = vsel %vm794_vm12, %v793_v6, %v785_v60 }
 0x14c   : > { %v820_v10 = vmul.f32 %v2237_v2, %v797_v45  ;;  %v821_v44 = vmul.f32 %v2240_v5, %v801_v46  ;;  %v822_v48 = vmul.f32 %v2237_v2, %v798_v7  ;;  %v823_v11 = vmul.f32 %v2240_v5, %v802_v9 }
 0x14e   : > { %v1525_v12 = vpack.c.bf16 %v821_v44, %v820_v10  ;;  %v1526_v13 = vpack.c.bf16 %v823_v11, %v822_v48  ;;  %v701_v14 = vpop.permute.xlu0 %700  ;;  %v703_v16 = vpop.permute.xlu1 %702 }
 0x150   : > { %v854_v17 = vrot.slane %v1525_v12, 6  ;;  %v855_v18 = vrot.slane %v1526_v13, 6 }
 0x152   : > { %862 = vst [vmem:[#allocation2 + $0x68] sm:$0xcc] %v854_v17  ;;  %863 = vst [vmem:[#allocation2 + $0x90] sm:$0xcc] %v855_v18  ;;  %v709_v19 = vpop.permute.xlu0 %708  ;;  %v711_v23 = vpop.permute.xlu1 %710 }
 0x153   : > { %v715_v24 = vsel %vm712_vm13, %v701_v14, %v709_v19  ;;  %v719_v29 = vsel %vm712_vm13, %v709_v19, %v701_v14  ;;  %v716_v2 = vsel %vm712_vm13, %v703_v16, %v711_v23  ;;  %v720_v5 = vsel %vm712_vm13, %v711_v23, %v703_v16 }
 0x154   : > { %v738_v30 = vmul.f32 %v2256_v34, %v715_v24  ;;  %v739_v31 = vmul.f32 %v2259_v35, %v719_v29  ;;  %v740_v32 = vmul.f32 %v2256_v34, %v716_v2  ;;  %v741_v33 = vmul.f32 %v2259_v35, %v720_v5 }
 0x156   : > { %v1521_v36 = vpack.c.bf16 %v739_v31, %v738_v30  ;;  %v1522_v3 = vpack.c.bf16 %v741_v33, %v740_v32  ;;  %v869_v15 = vpop.permute.xlu0 %868  ;;  %v871_v4 = vpop.permute.xlu1 %870 }
 0x158   : > { %776 = vst [vmem:[#allocation2 + $0x68] sm:$0x33] %v1521_v36  ;;  %777 = vst [vmem:[#allocation2 + $0x90] sm:$0x33] %v1522_v3 }
 0x15a   : > { %v877_v37 = vpop.permute.xlu0 %876  ;;  %v879_v38 = vpop.permute.xlu1 %878 }
 0x15b   : > { %v883_v39 = vsel %vm880_vm14, %v869_v15, %v877_v37  ;;  %v887_v41 = vsel %vm880_vm14, %v877_v37, %v869_v15  ;;  %v884_v42 = vsel %vm880_vm14, %v871_v4, %v879_v38  ;;  %v888_v34 = vsel %vm880_vm14, %v879_v38, %v871_v4 }
 0x15c   : > { %v906_v35 = vmul.f32 %v2275_v55, %v883_v39  ;;  %v907_v43 = vmul.f32 %v2278_v56, %v887_v41  ;;  %v908_v47 = vmul.f32 %v2275_v55, %v884_v42  ;;  %v909_v49 = vmul.f32 %v2278_v56, %v888_v34 }
 0x15e   : > { %v1529_v50 = vpack.c.bf16 %v907_v43, %v906_v35  ;;  %v1530_v51 = vpack.c.bf16 %v909_v49, %v908_v47 }
 0x15f   : > { %v1641_v26 = vld [vmem:[#allocation2 + $0x60] ss:$8 sps:$4 sm:$0xff]   ;;  %v1643_v52 = vld [vmem:[#allocation2 + $0x64] ss:$8 sps:$4 sm:$0xff]  }
 0x160   : > { %944 = vst [vmem:[#allocation2 + $0x70] sm:$0x33] %v1529_v50  ;;  %945 = vst [vmem:[#allocation2 + $0x98] sm:$0x33] %v1530_v51  ;;  %v1644_v25 = vld [vmem:[#allocation2 + $0x88] ss:$8 sps:$4 sm:$0xff]   ;;  %1173 = vmatprep.subr.bf16.mxu0 %v1643_v52 }
 0x161   : > { %v1646_v28 = vld [vmem:[#allocation2 + $0x8c] ss:$8 sps:$4 sm:$0xff]   ;;  %1174 = vmatpush1.bf16.msra.mxu0 %v1641_v26 }
 0x162   : > { %1254 = vmatprep.subr.bf16.mxu1 %v1646_v28 }
 0x163   : > { %1255 = vmatpush1.bf16.msra.mxu1 %v1644_v25 }
 0x167   : > { %v1139_v20 = vld [vmem:[#allocation2 + $0x70] sm:$0x77]  ;;  %v1220_v27 = vld [vmem:[#allocation2 + $0x98] sm:$0x77] }
 0x168   : > { %v1473_v53 = vcombine.low %v1139_v20, %v1139_v20  ;;  %v1474_v54 = vcombine.high %v1139_v20, %v1139_v20  ;;  %v1482_v55 = vcombine.low %v1220_v27, %v1220_v27  ;;  %v1483_v57 = vcombine.high %v1220_v27, %v1220_v27 }
 0x16a   : > { %v1169_v56 = vand.u32 %v1474_v54, %v2305_v40  ;;  %v1250_v58 = vand.u32 %v1483_v57, %v2305_v40  ;;  %v1166_v59 = vand.u32 %v1473_v53, %v2305_v40  ;;  %v1247_v60 = vand.u32 %v1482_v55, %v2305_v40 }
 0x16c   : > { %1175 = vmatprep.subr.bf16.mxu0 %v1169_v56  ;;  %1256 = vmatprep.subr.bf16.mxu1 %v1250_v58 }
 0x16d   : > { %1176 = vmatpush1.bf16.msra.mxu0 %v1166_v59  ;;  %1257 = vmatpush1.bf16.msra.mxu1 %v1247_v60 }
 0x170   : > { %1475 = vmatmul.mubr.msk.bf16.vlgmr.msra.gmra.mrb[4].mxu0 %vm996_vm1, %v2323_v8  ;;  %1484 = vmatmul.mubr.msk.bf16.vlgmr.msra.gmra.mrb[4].mxu1 %vm996_vm1, %v2323_v8 }
 0x205   : > { %v1044_v61 = vpop.f32.mrb[0].mxu0  ;;  %v1124_v62 = vpop.f32.mrb[0].mxu1 }
 0x206   : > { %1051 = vst [vmem:[%s216_s4] sm:$0xff] %v1044_v61  ;;  %1467 = vst [vmem:[%s216_s4 + $0x10] sm:$0xff] %v1124_v62  ;;  %v1046_v21 = vpop.f32.mrb[1].mxu0  ;;  %v1126_v63 = vpop.f32.mrb[1].mxu1 }
 0x207   : > { %1052 = vst [vmem:[%s216_s4 + $0x8] sm:$0xff] %v1046_v21  ;;  %1468 = vst [vmem:[%s216_s4 + $0x18] sm:$0xff] %v1126_v63  ;;  %v1048_v40 = vpop.f32.mrb[2].mxu0  ;;  %v1128_v22 = vpop.f32.mrb[2].mxu1 }
 0x208   : > { %v1049_v0 = vpop.f32.mrb[3].mxu0  ;;  %v1129_v1 = vpop.f32.mrb[3].mxu1 }
 0x243   : > { %v1205_v8 = vpop.f32.mrb[4].mxu0  ;;  %v1286_v6 = vpop.f32.mrb[4].mxu1 }
 0x244   : > { %1476 = vst [vmem:[%s216_s4 + $0x20] sm:$0xff] %v1205_v8  ;;  %1485 = vst [vmem:[%s216_s4 + $0x30] sm:$0xff] %v1286_v6  ;;  %v1207_v45 = vpop.f32.mrb[5].mxu0  ;;  %v1288_v46 = vpop.f32.mrb[5].mxu1 }
 0x245   : > { %1477 = vst [vmem:[%s216_s4 + $0x28] sm:$0xff] %v1207_v45  ;;  %1486 = vst [vmem:[%s216_s4 + $0x38] sm:$0xff] %v1288_v46  ;;  %v1209_v7 = vpop.f32.mrb[6].mxu0  ;;  %v1290_v9 = vpop.f32.mrb[6].mxu1 }
 0x246   : > { %v1210_v10 = vpop.f32.mrb[7].mxu0  ;;  %v1291_v44 = vpop.f32.mrb[7].mxu1 }
 0x247   : > { %1750 = shalt.err (!%p1747_p6)
}
 0x248   : > { %s1751_s9 = scalar_lea.hbm %s2418_s5, 1024  ;;  %s1755_s20 = scalar_lea.hbm %s2465_s3, 4096 }
 0x249   : > { %p1752_p12 = scmp.ne.s32.totalorder %s2418_s5, %s1751_s9  ;;  %p1756_p11 = scmp.lt.u32.totalorder %s2418_s5, %s2465_s3 }
 0x24a   : > { %p1757_p0 = scmp.lt.u32.totalorder %s1755_s20, %s1751_s9  ;;  %p1759_p7 = scmp.lt.u32.totalorder %s1751_s9, %s2418_s5 }
 0x24b   : > { %p1753_p13 = pnand %p1752_p12, %p2485_p5 }
 0x24c   : > { %p1758_p3 = por %p1757_p0, %p1756_p11 }
 0x24d   : > { %p1754_p4 = pneg %p1753_p13 }
 0x24e   : > { %p1760_p9 = por %p1759_p7, %p1758_p3 }
 0x250   : > { %p1761_p10 = pnand %p1760_p9, %p1754_p4 }
 0x252   : > { %1764 = shalt.err (!%p1761_p10)
}
 0x253   : > { %s1827_s4 = smov 256  }
 0x254   : > { %1543 = dma.vmem_to_hbm [thread:$0]  (%p2485_p5), %s2413_s6, 1024, %s2418_s5, %s1297_s16, %s1827_s4, %s1827_s4, %s1817_s30  }
 0x255 PF: > { %p1565_p1 = scmp.ge.s32.totalorder %s1807_s15, 2  ;;  %s1326_s7 = sand.u32 1, %s1795_s12  }
 0x256   : > { %p2486_p2 = scmp.ne.s32.totalorder %s2474_s25, 0  ;;  %s1327_s8 = scalar_lea.sflag [#allocation5], %s1326_s7 }
 0x258   : > { %p1557_p8 = pnand %p1565_p1, %p2486_p2 }
 0x25a   : > { %1790 = dma.done.wait (!%p1557_p8), %s1327_s8, 1024  }
 0x25b   : > { %1792 = vsyncadd (!%p1557_p8), %s1327_s8, 4294966272  ;;  %p17_p6 = scmp.ge.s32.totalorder %s1873_s18, 6   ;;  %s2487_s12 = smov %s1799_s13 }
 0x25c   : > { %s2488_s13 = smov %s1803_s14  ;;  %s2489_s14 = smov %s1885_s21 }
 0x25d   : > { %s2490_s15 = smov %s1873_s18  ;;  %19 = sbr.rel (!%p17_p6) target bundleno = 6 (0x6), region = 98 }
 0x264   :  { %1332 = vsyncpa [#allocation4], 1 }
 0x265   :  { %1334 = vsyncpa [#allocation4 + $0x1], 1 }
 0x266   :  { %1335 = vsyncpa [#allocation7], 1 }
 0x267   :  { %1336 = vsyncpa [#allocation5], 1 }
 0x268   :  { %1338 = vsyncpa [#allocation5 + $0x1], 1 }

</bundles_post_ra>
